<compile_context>
chip_gen: v7x
topology: tpu7x:2x2x1
jax: 0.10.0
libtpu: 0.0.40
codegen_flags: <defaults>
</compile_context>

<pallas_src>
import functools

import jax
import jax.numpy as jnp
from jax import lax
from jax.experimental import pallas as pl
from jax.experimental.pallas import tpu as pltpu

LANE_ALIGN = 128      # lane / MXU-contraction axes: n0, n1, all feature dims
SUBLANE_ALIGN = 16    # pure sublane (dst-row-only) axis: n2


def _round_up(x, m):
    return (x + m - 1) // m * m


def _pad2d(x, rows, cols):
    return jnp.pad(x, ((0, rows - x.shape[0]), (0, cols - x.shape[1])))


def _vmem():
    return pl.BlockSpec(memory_space=pltpu.MemorySpace.VMEM)


# ------------------------------ fused kernel --------------------------------

def _graphsage_fused_kernel(n1_real, n2_real,
                            a0_ref, a1_ref, x_ref,
                            w1_ref, b1_ref,
                            w2_ref, b2_ref,
                            wfc_ref, bfc_ref, o_ref):
    """Whole GraphSAGE forward fused in VMEM.

    a0 : (n1p, n0p) bf16  row-normalized neighbor adjacency, block 0
    a1 : (n2p, n1p) bf16  row-normalized neighbor adjacency, block 1
    x  : (n0p, f0p) bf16  src features
    w1 : (2*f0p, h1p) bf16  fused [w_self1 ; w_neigh1]
    w2 : (2*h1p, h2p) bf16  fused [w_self2 ; w_neigh2]
    wfc: (h2p, outp) bf16 ; b* : (1, *) f32 ; o : (n2p, outp) f32
    n1_real / n2_real are the unpadded dst counts (static Python ints).
    """
    n1p = a0_ref.shape[0]
    n2p = a1_ref.shape[0]

    x = x_ref[...]                                                   # bf16

    # ---- SAGEConv 1 (mean) : fused [self | neigh] matmul + sigmoid ----
    agg0 = jnp.dot(a0_ref[...], x, preferred_element_type=jnp.float32)
    cat1 = jnp.concatenate([x[:n1p, :], agg0.astype(jnp.bfloat16)], axis=1)
    z1 = (jnp.dot(cat1, w1_ref[...], preferred_element_type=jnp.float32)
          + b1_ref[...])
    h1 = jax.nn.sigmoid(z1)
    # zero padded / non-dst rows so downstream use never sees garbage rows
    row1 = lax.broadcasted_iota(jnp.int32, z1.shape, 0)
    h1 = jnp.where(row1 < n1_real, h1, 0.0).astype(jnp.bfloat16)     # (n1p, h1p)

    # ---- SAGEConv 2 (mean) : fused [self | neigh] matmul + sigmoid ----
    agg1 = jnp.dot(a1_ref[...], h1, preferred_element_type=jnp.float32)
    cat2 = jnp.concatenate([h1[:n2p, :], agg1.astype(jnp.bfloat16)], axis=1)
    z2 = (jnp.dot(cat2, w2_ref[...], preferred_element_type=jnp.float32)
          + b2_ref[...])
    h2 = jax.nn.sigmoid(z2)
    row2 = lax.broadcasted_iota(jnp.int32, z2.shape, 0)
    h2 = jnp.where(row2 < n2_real, h2, 0.0).astype(jnp.bfloat16)     # (n2p, h2p)

    # ---- fc (no activation, matches torch forward) ----
    o_ref[...] = (jnp.dot(h2, wfc_ref[...], preferred_element_type=jnp.float32)
                  + bfc_ref[...])


# -------------------------------- wrapper -----------------------------------

def graphsage_forward(blocks, x, params):
    """Mirrors GraphSAGE.forward. blocks = (a0, a1) dense row-normalized
    adjacencies with DGL-MFG dst-prefix convention: a0 (N1, N0), a1 (N2, N1),
    x (N0, in_feats)."""
    a0, a1 = blocks
    n1, n0 = a0.shape
    n2, n1b = a1.shape
    assert n1b == n1 and x.shape[0] == n0 and n2 <= n1 <= n0

    in_feats = x.shape[1]
    h1_dim = params["w_self1"].shape[1]
    h2_dim = params["w_self2"].shape[1]
    out_feats = params["w_fc"].shape[1]

    # padded sizes: lane/contraction axes -> 128, sublane-only dst rows -> 16
    f0p, h1p, h2p, outp = (_round_up(d, LANE_ALIGN)
                           for d in (in_feats, h1_dim, h2_dim, out_feats))
    n0p = _round_up(n0, LANE_ALIGN)      # lane axis of a0, K of a0 @ x
    n1p = _round_up(n1, LANE_ALIGN)      # lane axis of a1, K of a1 @ h1
    n2p = _round_up(n2, SUBLANE_ALIGN)   # dst rows only (sublane)

    bf16 = jnp.bfloat16
    a0p = _pad2d(a0, n1p, n0p).astype(bf16)
    a1p = _pad2d(a1, n2p, n1p).astype(bf16)
    xp = _pad2d(x, n0p, f0p).astype(bf16)

    # fused [w_self ; w_neigh] weights -> one MXU dot per layer with K = 2*f_p
    w1 = jnp.concatenate(
        [_pad2d(params["w_self1"], f0p, h1p),
         _pad2d(params["w_neigh1"], f0p, h1p)], axis=0).astype(bf16)
    w2 = jnp.concatenate(
        [_pad2d(params["w_self2"], h1p, h2p),
         _pad2d(params["w_neigh2"], h1p, h2p)], axis=0).astype(bf16)
    b1 = _pad2d(params["b1"], 1, h1p).astype(jnp.float32)
    b2 = _pad2d(params["b2"], 1, h2p).astype(jnp.float32)
    wfc = _pad2d(params["w_fc"], h2p, outp).astype(bf16)
    bfc = _pad2d(params["b_fc"], 1, outp).astype(jnp.float32)

    # scoped-VMEM budget: operands + f32 intermediates, 2x headroom.
    operand_bytes = sum(int(a.size) * a.dtype.itemsize
                        for a in (a0p, a1p, xp, w1, b1, w2, b2, wfc, bfc))
    inter_bytes = 4 * (n1p * f0p + 2 * n1p * h1p
                       + n2p * h1p + 2 * n2p * h2p + n2p * outp)
    out_bytes = 4 * n2p * outp
    vmem_limit = int(min(2 * (operand_bytes + inter_bytes + out_bytes)
                         + (8 << 20), 128 << 20))

    out_padded = pl.pallas_call(
        functools.partial(_graphsage_fused_kernel, n1, n2),
        out_shape=jax.ShapeDtypeStruct((n2p, outp), jnp.float32),
        in_specs=[_vmem()] * 9,
        out_specs=_vmem(),
        compiler_params=pltpu.CompilerParams(vmem_limit_bytes=vmem_limit),
    )(a0p, a1p, xp, w1, b1, w2, b2, wfc, bfc)

    return out_padded[:n2, :out_feats]


# ----------------------------- demo / self-check ----------------------------

if __name__ == "__main__":
    key = jax.random.PRNGKey(0)
    ks = jax.random.split(key, 12)

    # small sizes; DGL MFG convention: dst nodes are a prefix of src nodes
    n0, n1, n2 = 32, 24, 16
    in_feats, hidden1, hidden2, out_feats = 8, 32, 16, 4

    x = jax.random.normal(ks[0], (n0, in_feats), jnp.float32)

    def make_block(k, n_dst, n_src):
        adj = jax.random.bernoulli(k, 0.3, (n_dst, n_src)).astype(jnp.float32)
        # DGL SAGEConv('mean') aggregates neighbors only -> drop self edges
        adj = adj * (1.0 - jnp.eye(n_dst, n_src, dtype=jnp.float32))
        deg = jnp.maximum(adj.sum(axis=-1, keepdims=True), 1.0)  # 0-deg -> 0 agg
        return adj / deg

    a0 = make_block(ks[1], n1, n0)
    a1 = make_block(ks[2], n2, n1)

    def glorot(k, shape):
        lim = (6.0 / (shape[0] + shape[1])) ** 0.5
        return jax.random.uniform(k, shape, jnp.float32, -lim, lim)

    params = {
        "w_self1":  glorot(ks[3], (in_feats, hidden1)),
        "w_neigh1": glorot(ks[4], (in_feats, hidden1)),
        "b1":       0.1 * jax.random.normal(ks[8], (1, hidden1), jnp.float32),
        "w_self2":  glorot(ks[5], (hidden1, hidden2)),
        "w_neigh2": glorot(ks[6], (hidden1, hidden2)),
        "b2":       0.1 * jax.random.normal(ks[9], (1, hidden2), jnp.float32),
        "w_fc":     glorot(ks[7], (hidden2, out_feats)),
        "b_fc":     0.1 * jax.random.normal(ks[10], (1, out_feats), jnp.float32),
    }

    out = graphsage_forward((a0, a1), x, params)
    out = jax.block_until_ready(out)

    # pure-JAX f32 reference (same math, unpadded)
    def reference(a0, a1, x, p):
        h = jax.nn.sigmoid(x[: a0.shape[0]] @ p["w_self1"]
                           + (a0 @ x) @ p["w_neigh1"] + p["b1"])
        h = jax.nn.sigmoid(h[: a1.shape[0]] @ p["w_self2"]
                           + (a1 @ h) @ p["w_neigh2"] + p["b2"])
        return h @ p["w_fc"] + p["b_fc"]

    ref = reference(a0, a1, x, params)
    assert out.shape == (n2, out_feats)
    assert bool(jnp.all(jnp.isfinite(out)))
    assert bool(jnp.allclose(out, ref, atol=1e-1, rtol=5e-2)), \
        ("max abs err", float(jnp.max(jnp.abs(out - ref))))
    print("KERNEL_OK")
</pallas_src>

<mosaic_0001>
module attributes {stable_mosaic.version = 11 : i64} {
  func.func @_graphsage_fused_kernel(%arg0: memref<128x128xbf16, #tpu.memory_space<vmem>>, %arg1: memref<16x128xbf16, #tpu.memory_space<vmem>>, %arg2: memref<128x128xbf16, #tpu.memory_space<vmem>>, %arg3: memref<256x128xbf16, #tpu.memory_space<vmem>>, %arg4: memref<1x128xf32, #tpu.memory_space<vmem>>, %arg5: memref<256x128xbf16, #tpu.memory_space<vmem>>, %arg6: memref<1x128xf32, #tpu.memory_space<vmem>>, %arg7: memref<128x128xbf16, #tpu.memory_space<vmem>>, %arg8: memref<1x128xf32, #tpu.memory_space<vmem>>, %arg9: memref<16x128xf32, #tpu.memory_space<vmem>>) attributes {dimension_semantics = [], scalar_prefetch = 0 : i64, scratch_operands = 0 : i64, tpu.core_type = #tpu.core_type<tc>} {
    %c0 = arith.constant 0 : index
    %c0_0 = arith.constant 0 : index
    %0 = vector.load %arg2[%c0, %c0_0] : memref<128x128xbf16, #tpu.memory_space<vmem>>, vector<128x128xbf16>
    %c0_1 = arith.constant 0 : index
    %c0_2 = arith.constant 0 : index
    %1 = vector.load %arg0[%c0_1, %c0_2] : memref<128x128xbf16, #tpu.memory_space<vmem>>, vector<128x128xbf16>
    %cst = arith.constant dense<0.000000e+00> : vector<128x128xf32>
    %2 = tpu.matmul %1, %0, %cst {dimension_numbers = #tpu.dot_dimension_numbers<[1], [0], [0], [1], [0, 0, 1, 1], [], []>} : vector<128x128xbf16>, vector<128x128xbf16>, vector<128x128xf32> -> vector<128x128xf32>
    %3 = arith.truncf %2 : vector<128x128xf32> to vector<128x128xbf16>
    %4 = tpu.concatenate %0, %3 in 1 : vector<128x128xbf16>, vector<128x128xbf16> -> vector<128x256xbf16>
    %c0_3 = arith.constant 0 : index
    %c0_4 = arith.constant 0 : index
    %5 = vector.load %arg3[%c0_3, %c0_4] : memref<256x128xbf16, #tpu.memory_space<vmem>>, vector<256x128xbf16>
    %cst_5 = arith.constant dense<0.000000e+00> : vector<128x128xf32>
    %6 = tpu.matmul %4, %5, %cst_5 {dimension_numbers = #tpu.dot_dimension_numbers<[1], [0], [0], [1], [0, 0, 1, 1], [], []>} : vector<128x256xbf16>, vector<256x128xbf16>, vector<128x128xf32> -> vector<128x128xf32>
    %c0_6 = arith.constant 0 : index
    %c0_7 = arith.constant 0 : index
    %7 = vector.load %arg4[%c0_6, %c0_7] : memref<1x128xf32, #tpu.memory_space<vmem>>, vector<1x128xf32>
    %8 = vector.broadcast %7 : vector<1x128xf32> to vector<128x128xf32>
    %9 = arith.addf %6, %8 : vector<128x128xf32>
    %10 = arith.negf %9 : vector<128x128xf32>
    %11 = math.exp %10 : vector<128x128xf32>
    %cst_8 = arith.constant 1.000000e+00 : f32
    %12 = vector.broadcast %cst_8 : f32 to vector<128x128xf32>
    %13 = arith.addf %12, %11 : vector<128x128xf32>
    %14 = arith.divf %12, %13 : vector<128x128xf32>
    %15 = tpu.iota {dimensions = array<i32: 0>} : vector<128x128xi32>
    %c24_i32 = arith.constant 24 : i32
    %16 = vector.broadcast %c24_i32 : i32 to vector<128x128xi32>
    %17 = arith.cmpi slt, %15, %16 : vector<128x128xi32>
    %cst_9 = arith.constant 0.000000e+00 : f32
    %18 = vector.broadcast %cst_9 : f32 to vector<128x128xf32>
    %19 = arith.select %17, %14, %18 : vector<128x128xi1>, vector<128x128xf32>
    %20 = arith.truncf %19 : vector<128x128xf32> to vector<128x128xbf16>
    %c0_10 = arith.constant 0 : index
    %c0_11 = arith.constant 0 : index
    %21 = vector.load %arg1[%c0_10, %c0_11] : memref<16x128xbf16, #tpu.memory_space<vmem>>, vector<16x128xbf16>
    %cst_12 = arith.constant dense<0.000000e+00> : vector<16x128xf32>
    %22 = tpu.matmul %21, %20, %cst_12 {dimension_numbers = #tpu.dot_dimension_numbers<[1], [0], [0], [1], [0, 0, 1, 1], [], []>} : vector<16x128xbf16>, vector<128x128xbf16>, vector<16x128xf32> -> vector<16x128xf32>
    %23 = vector.extract_strided_slice %20 {offsets = [0, 0], sizes = [16, 128], strides = [1, 1]} : vector<128x128xbf16> to vector<16x128xbf16>
    %24 = arith.truncf %22 : vector<16x128xf32> to vector<16x128xbf16>
    %25 = tpu.concatenate %23, %24 in 1 : vector<16x128xbf16>, vector<16x128xbf16> -> vector<16x256xbf16>
    %c0_13 = arith.constant 0 : index
    %c0_14 = arith.constant 0 : index
    %26 = vector.load %arg5[%c0_13, %c0_14] : memref<256x128xbf16, #tpu.memory_space<vmem>>, vector<256x128xbf16>
    %cst_15 = arith.constant dense<0.000000e+00> : vector<16x128xf32>
    %27 = tpu.matmul %25, %26, %cst_15 {dimension_numbers = #tpu.dot_dimension_numbers<[1], [0], [0], [1], [0, 0, 1, 1], [], []>} : vector<16x256xbf16>, vector<256x128xbf16>, vector<16x128xf32> -> vector<16x128xf32>
    %c0_16 = arith.constant 0 : index
    %c0_17 = arith.constant 0 : index
    %28 = vector.load %arg6[%c0_16, %c0_17] : memref<1x128xf32, #tpu.memory_space<vmem>>, vector<1x128xf32>
    %29 = vector.broadcast %28 : vector<1x128xf32> to vector<16x128xf32>
    %30 = arith.addf %27, %29 : vector<16x128xf32>
    %31 = arith.negf %30 : vector<16x128xf32>
    %32 = math.exp %31 : vector<16x128xf32>
    %cst_18 = arith.constant 1.000000e+00 : f32
    %33 = vector.broadcast %cst_18 : f32 to vector<16x128xf32>
    %34 = arith.addf %33, %32 : vector<16x128xf32>
    %35 = arith.divf %33, %34 : vector<16x128xf32>
    %36 = tpu.iota {dimensions = array<i32: 0>} : vector<16x128xi32>
    %c16_i32 = arith.constant 16 : i32
    %37 = vector.broadcast %c16_i32 : i32 to vector<16x128xi32>
    %38 = arith.cmpi slt, %36, %37 : vector<16x128xi32>
    %cst_19 = arith.constant 0.000000e+00 : f32
    %39 = vector.broadcast %cst_19 : f32 to vector<16x128xf32>
    %40 = arith.select %38, %35, %39 : vector<16x128xi1>, vector<16x128xf32>
    %41 = arith.truncf %40 : vector<16x128xf32> to vector<16x128xbf16>
    %c0_20 = arith.constant 0 : index
    %c0_21 = arith.constant 0 : index
    %42 = vector.load %arg7[%c0_20, %c0_21] : memref<128x128xbf16, #tpu.memory_space<vmem>>, vector<128x128xbf16>
    %cst_22 = arith.constant dense<0.000000e+00> : vector<16x128xf32>
    %43 = tpu.matmul %41, %42, %cst_22 {dimension_numbers = #tpu.dot_dimension_numbers<[1], [0], [0], [1], [0, 0, 1, 1], [], []>} : vector<16x128xbf16>, vector<128x128xbf16>, vector<16x128xf32> -> vector<16x128xf32>
    %c0_23 = arith.constant 0 : index
    %c0_24 = arith.constant 0 : index
    %44 = vector.load %arg8[%c0_23, %c0_24] : memref<1x128xf32, #tpu.memory_space<vmem>>, vector<1x128xf32>
    %45 = vector.broadcast %44 : vector<1x128xf32> to vector<16x128xf32>
    %46 = arith.addf %43, %45 : vector<16x128xf32>
    %c0_25 = arith.constant 0 : index
    %c0_26 = arith.constant 0 : index
    %47 = vector.load %arg9[%c0_25, %c0_26] : memref<16x128xf32, #tpu.memory_space<vmem>>, vector<16x128xf32>
    tpu.vector_store %arg9[%c0_25, %c0_26], %46 {strides = array<i32>} : memref<16x128xf32, #tpu.memory_space<vmem>>, vector<16x128xf32>,
    return
  }
}

</mosaic_0001>

<bundles_post_ra>
// kernel: tpu_custom_call.1
= control target key start
LH: loop header
LB: loop body
LE: loop exit
PB: predicated region body
PF: predicated region fallthrough
CT: control target
= control target key end

     0   :  { %14 = vsyncpa [#allocation3], 0  ;;  %s1871_s0 = inlined_call_operand.hbm [shape: bf16[128,128], index: 0, kind: input, shape index: {}]   ;;  %s1872_s1 = inlined_call_operand.hbm [shape: bf16[16,128], index: 1, kind: input, shape index: {}]   ;;  %s1873_s2 = inlined_call_operand.hbm [shape: bf16[128,128], index: 2, kind: input, shape index: {}]   ;;  %s1874_s3 = inlined_call_operand.hbm [shape: bf16[256,128], index: 3, kind: input, shape index: {}]   ;;  %s1875_s4 = inlined_call_operand.vmem [shape: f32[1,128], index: 4, kind: input, shape index: {}]   ;;  %s1876_s5 = inlined_call_operand.hbm [shape: bf16[256,128], index: 5, kind: input, shape index: {}]   ;;  %s1877_s6 = inlined_call_operand.vmem [shape: f32[1,128], index: 6, kind: input, shape index: {}]   ;;  %s1878_s7 = inlined_call_operand.hbm [shape: bf16[128,128], index: 7, kind: input, shape index: {}]   ;;  %s1879_s8 = inlined_call_operand.vmem [shape: f32[1,128], index: 8, kind: input, shape index: {}]   ;;  %s1880_s9 = inlined_call_operand.hbm [shape: f32[16,128], index: 9, kind: output, shape index: {}]  }
   0x1   :  { %15 = vsyncpa [#allocation6], 0 }
   0x2   :  { %16 = vsyncpa [#allocation9], 0 }
   0x3   :  { %17 = vsyncpa [#allocation12], 0 }
   0x4   :  { %18 = vsyncpa [#allocation4], 0  ;;  %s1617_s30 = smov [#allocation5]   ;;  %s1618_s11 = smov [#allocation8]  }
   0x5   :  { %s36_s10 = sshll.u32 %s1617_s30, 4  ;;  %s60_s12 = sshll.u32 %s1618_s11, 4  ;;  %s37_s10 = int_to_ptr.vmem [resolvable:$true] %s36_s10  ;;  %s1680_s12 = int_to_ptr.vmem [resolvable:$true] %s60_s12 }
   0x6   :  { %s1453_s15 = scalar_lea.hbm %s1872_s1, 128 }
   0x7   :  { %p1454_p0 = scmp.ne.s32.totalorder %s1872_s1, %s1453_s15  ;;  %p1457_p1 = scmp.lt.u32.totalorder %s1453_s15, %s1872_s1 }
   0x9   :  { %p1459_p2 = pnand %p1457_p1, %p1454_p0 }
   0xb   :  { %1462 = shalt.err (!%p1459_p2)
}
   0xc   :  { %s1463_s20 = scalar_lea.vmem %s37_s10, 128  ;;  %p1468_p4 = scmp.lt.s32.totalorder %s37_s10, %s37_s10 }
   0xd   :  { %p1464_p3 = scmp.ne.s32.totalorder %s37_s10, %s1463_s20  ;;  %p1469_p5 = scmp.lt.s32.totalorder %s1463_s20, %s1463_s20 }
   0xf   :  { %p1470_p6 = por %p1469_p5, %p1468_p4 }
  0x11   :  { %p1471_p7 = pnand %p1470_p6, %p1464_p3 }
  0x13   :  { %1474 = shalt.err (!%p1471_p7)
}
  0x14   :  { %s1619_s21 = smov 64   ;;  %s1620_s22 = smov 4  }
  0x15   :  { %42 = dma.hbm_to_vmem [thread:$0]  %s1872_s1, 128, %s37_s10, [#allocation6], %s1619_s21, %s1619_s21, %s1620_s22  }
  0x16   :  { %s1475_s27 = scalar_lea.hbm %s1874_s3, 2048 }
  0x17   :  { %p1476_p8 = scmp.ne.s32.totalorder %s1874_s3, %s1475_s27  ;;  %p1479_p9 = scmp.lt.u32.totalorder %s1475_s27, %s1874_s3 }
  0x19   :  { %p1481_p10 = pnand %p1479_p9, %p1476_p8 }
  0x1b   :  { %1484 = shalt.err (!%p1481_p10)
}
  0x1c   :  { %s1485_s13 = scalar_lea.vmem %s1680_s12, 2048  ;;  %p1490_p12 = scmp.lt.s32.totalorder %s1680_s12, %s1680_s12 }
  0x1d   :  { %p1486_p11 = scmp.ne.s32.totalorder %s1680_s12, %s1485_s13  ;;  %p1491_p13 = scmp.lt.s32.totalorder %s1485_s13, %s1485_s13 }
  0x1f   :  { %p1492_p0 = por %p1491_p13, %p1490_p12 }
  0x21   :  { %p1493_p1 = pnand %p1492_p0, %p1486_p11 }
  0x23   :  { %1496 = shalt.err (!%p1493_p1)
}
  0x24   :  { %66 = dma.hbm_to_vmem [thread:$0]  %s1874_s3, 2048, %s1680_s12, [#allocation9], %s1619_s21, %s1619_s21, %s1620_s22  }
  0x25   :  { %s1621_s14 = smov [#allocation2]   ;;  %s1622_s16 = smov [#allocation7]  }
  0x26   :  { %s24_s15 = sshll.u32 %s1621_s14, 4  ;;  %s48_s17 = sshll.u32 %s1622_s16, 4  ;;  %s25_s15 = int_to_ptr.vmem [resolvable:$true] %s24_s15  ;;  %s1717_s17 = int_to_ptr.vmem [resolvable:$true] %s48_s17 }
  0x27   :  { %s1497_s20 = scalar_lea.hbm %s1871_s0, 1024 }
  0x28   :  { %p1498_p2 = scmp.ne.s32.totalorder %s1871_s0, %s1497_s20  ;;  %p1501_p3 = scmp.lt.u32.totalorder %s1497_s20, %s1871_s0 }
  0x2a   :  { %p1503_p4 = pnand %p1501_p3, %p1498_p2 }
  0x2c   :  { %1506 = shalt.err (!%p1503_p4)
}
  0x2d   :  { %s1507_s3 = scalar_lea.vmem %s25_s15, 1024  ;;  %p1512_p6 = scmp.lt.s32.totalorder %s25_s15, %s25_s15 }
  0x2e   :  { %p1508_p5 = scmp.ne.s32.totalorder %s25_s15, %s1507_s3  ;;  %p1513_p7 = scmp.lt.s32.totalorder %s1507_s3, %s1507_s3 }
  0x30   :  { %p1514_p8 = por %p1513_p7, %p1512_p6 }
  0x32   :  { %p1515_p9 = pnand %p1514_p8, %p1508_p5 }
  0x34   :  { %1518 = shalt.err (!%p1515_p9)
}
  0x35   :  { %30 = dma.hbm_to_vmem [thread:$0]  %s1871_s0, 1024, %s25_s15, [#allocation3], %s1619_s21, %s1619_s21, %s1620_s22  }
  0x36   :  { %s1519_s30 = scalar_lea.hbm %s1873_s2, 1024 }
  0x37   :  { %p1520_p10 = scmp.ne.s32.totalorder %s1873_s2, %s1519_s30  ;;  %p1523_p11 = scmp.lt.u32.totalorder %s1519_s30, %s1873_s2 }
  0x39   :  { %p1525_p12 = pnand %p1523_p11, %p1520_p10 }
  0x3b   :  { %1528 = shalt.err (!%p1525_p12)
}
  0x3c   :  { %s1529_s14 = scalar_lea.vmem %s1717_s17, 1024  ;;  %p1534_p0 = scmp.lt.s32.totalorder %s1717_s17, %s1717_s17 }
  0x3d   :  { %p1530_p13 = scmp.ne.s32.totalorder %s1717_s17, %s1529_s14  ;;  %p1535_p1 = scmp.lt.s32.totalorder %s1529_s14, %s1529_s14 }
  0x3f   :  { %p1536_p2 = por %p1535_p1, %p1534_p0 }
  0x41   :  { %p1537_p3 = pnand %p1536_p2, %p1530_p13 }
  0x43   :  { %1540 = shalt.err (!%p1537_p3)
}
  0x44   :  { %54 = dma.hbm_to_vmem [thread:$0]  %s1873_s2, 1024, %s1717_s17, [#allocation6], %s1619_s21, %s1619_s21, %s1620_s22  }
  0x45   :  { %s1623_s16 = smov [#allocation10]   ;;  %s1624_s19 = smov [#allocation11]  }
  0x46   :  { %s74_s18 = sshll.u32 %s1623_s16, 4  ;;  %s88_s20 = sshll.u32 %s1624_s19, 4  ;;  %s75_s18 = int_to_ptr.vmem [resolvable:$true] %s74_s18  ;;  %s1754_s20 = int_to_ptr.vmem [resolvable:$true] %s88_s20 }
  0x47   :  { %s1541_s25 = scalar_lea.hbm %s1876_s5, 2048 }
  0x48   :  { %p1542_p4 = scmp.ne.s32.totalorder %s1876_s5, %s1541_s25  ;;  %p1545_p5 = scmp.lt.u32.totalorder %s1541_s25, %s1876_s5 }
  0x4a   :  { %p1547_p6 = pnand %p1545_p5, %p1542_p4 }
  0x4c   :  { %1550 = shalt.err (!%p1547_p6)
}
  0x4d   :  { %s1551_s2 = scalar_lea.vmem %s75_s18, 2048  ;;  %p1556_p8 = scmp.lt.s32.totalorder %s75_s18, %s75_s18 }
  0x4e   :  { %p1552_p7 = scmp.ne.s32.totalorder %s75_s18, %s1551_s2  ;;  %p1557_p9 = scmp.lt.s32.totalorder %s1551_s2, %s1551_s2 }
  0x50   :  { %p1558_p10 = por %p1557_p9, %p1556_p8 }
  0x52   :  { %p1559_p11 = pnand %p1558_p10, %p1552_p7 }
  0x54   :  { %1562 = shalt.err (!%p1559_p11)
}
  0x55   :  { %80 = dma.hbm_to_vmem [thread:$0]  %s1876_s5, 2048, %s75_s18, [#allocation9], %s1619_s21, %s1619_s21, %s1620_s22  }
  0x56   :  { %s1563_s11 = scalar_lea.hbm %s1878_s7, 1024 }
  0x57   :  { %p1564_p12 = scmp.ne.s32.totalorder %s1878_s7, %s1563_s11  ;;  %p1567_p13 = scmp.lt.u32.totalorder %s1563_s11, %s1878_s7 }
  0x59   :  { %p1569_p0 = pnand %p1567_p13, %p1564_p12 }
  0x5b   :  { %1572 = shalt.err (!%p1569_p0)
}
  0x5c   :  { %s1573_s0 = scalar_lea.vmem %s1754_s20, 1024  ;;  %p1578_p2 = scmp.lt.s32.totalorder %s1754_s20, %s1754_s20 }
  0x5d   :  { %p1574_p1 = scmp.ne.s32.totalorder %s1754_s20, %s1573_s0  ;;  %p1579_p3 = scmp.lt.s32.totalorder %s1573_s0, %s1573_s0 }
  0x5f   :  { %p1580_p4 = por %p1579_p3, %p1578_p2 }
  0x61   :  { %p1581_p5 = pnand %p1580_p4, %p1574_p1 }
  0x63   :  { %1584 = shalt.err (!%p1581_p5)
}
  0x64   :  { %94 = dma.hbm_to_vmem [thread:$0]  %s1878_s7, 1024, %s1754_s20, [#allocation12], %s1619_s21, %s1619_s21, %s1620_s22  }
  0x65   :  { %1607 = dma.done.wait [#allocation3], 1024  }
  0x66   :  { %1608 = vsyncadd [#allocation3], 4294966272 }
  0x67   :  { %1609 = dma.done.wait [#allocation6], 1152  }
  0x68   :  { %1610 = vsyncadd [#allocation6], 4294966144 }
  0x69   :  { %1611 = dma.done.wait [#allocation9], 4096  }
  0x6a   :  { %1612 = vsyncadd [#allocation9], 4294963200 }
  0x6b   :  { %1613 = dma.done.wait [#allocation12], 1024  }
  0x6c   :  { %1614 = vsyncadd [#allocation12], 4294966272  ;;  %v1791_v0 = vld [vmem:[#allocation7] sm:$0xff]   ;;  %v1793_v1 = vld [vmem:[#allocation7 + $0x8] sm:$0xff]   ;;  %v1625_v37 = vmov 0.0   ;;  %vm1626_vm0 = vmmov 0  }
  0x6d   :  { %1303 = vmatprep.subr.bf16.mxu0 %v1791_v0  ;;  %v1798_v2 = vld [vmem:[#allocation7 + $0x10] sm:$0xff]   ;;  %v1801_v3 = vld [vmem:[#allocation7 + $0x18] sm:$0xff]   ;;  %v1804_v5 = vld [vmem:[#allocation7 + $0x20] sm:$0xff]   ;;  %s1627_s18 = smov [#allocation13]  }
  0x6e   :  { %1304 = vmatpush3.bf16.msra.mxu0 %v1791_v0  ;;  %v1384_v4 = vld [vmem:[#allocation2] sm:$0xff]   ;;  %v1386_v6 = vld [vmem:[#allocation8 + $0x40] sm:$0xff]   ;;  %v1388_v8 = vld [vmem:[#allocation8 + $0x48] sm:$0xff]   ;;  %s1096_s19 = sshll.u32 %s1627_s18, 4  ;;  %s1097_s19 = int_to_ptr.vmem [resolvable:$true] %s1096_s19 }
  0x6f   :  { %1305 = vmatprep.subr.bf16.mxu0 %v1793_v1  ;;  %1319 = vmatprep.mubr.bf16.mxu0 %v1384_v4  ;;  %v1387_v7 = vld [vmem:[#allocation8] sm:$0xff]   ;;  %v1389_v9 = vld [vmem:[#allocation8 + $0x8] sm:$0xff]   ;;  %v1390_v10 = vld [vmem:[#allocation8 + $0x50] sm:$0xff]   ;;  %s1585_s20 = scalar_lea.vmem %s1097_s19, 256  ;;  %p1590_p7 = scmp.lt.s32.totalorder %s1097_s19, %s1097_s19 }
  0x70   :  { %1205 = vmatprep.subr.bf16.mxu1 %v1386_v6  ;;  %v1810_v11 = vld [vmem:[#allocation7 + $0x28] sm:$0xff]   ;;  %v1391_v12 = vld [vmem:[#allocation8 + $0x10] sm:$0xff]   ;;  %v1392_v13 = vld [vmem:[#allocation8 + $0x58] sm:$0xff]   ;;  %p1586_p6 = scmp.ne.s32.totalorder %s1097_s19, %s1585_s20  ;;  %p1591_p8 = scmp.lt.s32.totalorder %s1585_s20, %s1585_s20 }
  0x71   :  { %1206 = vmatpush3.bf16.msra.mxu1 %v1387_v7  ;;  %v1814_v14 = vld [vmem:[#allocation7 + $0x30] sm:$0xff]   ;;  %v1393_v15 = vld [vmem:[#allocation8 + $0x18] sm:$0xff]   ;;  %v1394_v17 = vld [vmem:[#allocation8 + $0x60] sm:$0xff]  }
  0x72   :  { %1306 = vmatpush3.bf16.msra.mxu0 %v1793_v1  ;;  %1207 = vmatprep.subr.bf16.mxu1 %v1388_v8  ;;  %v1816_v16 = vld [vmem:[#allocation7 + $0x38] sm:$0xff]   ;;  %v1395_v18 = vld [vmem:[#allocation8 + $0x20] sm:$0xff]   ;;  %v1396_v19 = vld [vmem:[#allocation8 + $0x68] sm:$0xff]   ;;  %p1592_p9 = por %p1591_p8, %p1590_p7 }
  0x73   :  { %1307 = vmatprep.subr.bf16.mxu0 %v1798_v2  ;;  %v1397_v20 = vld [vmem:[#allocation8 + $0x28] sm:$0xff]   ;;  %v1385_v21 = vld [vmem:[#allocation2 + $0x8] sm:$0xff]   ;;  %v1398_v22 = vld [vmem:[#allocation8 + $0x70] sm:$0xff]  }
  0x74   :  { %v1399_v23 = vld [vmem:[#allocation8 + $0x30] sm:$0xff]   ;;  %v1400_v24 = vld [vmem:[#allocation8 + $0x78] sm:$0xff]   ;;  %v1402_v32 = vld [vmem:[#allocation2 + $0x10] sm:$0xff]   ;;  %p1593_p10 = pnand %p1592_p9, %p1586_p6 }
  0x75   :  { %1208 = vmatpush3.bf16.msra.mxu1 %v1389_v9  ;;  %v1401_v25 = vld [vmem:[#allocation8 + $0x38] sm:$0xff]   ;;  %v1403_v33 = vld [vmem:[#allocation2 + $0x18] sm:$0xff]   ;;  %v1405_v35 = vld [vmem:[#allocation2 + $0x28] sm:$0xff]  }
  0x76   :  { %1308 = vmatpush3.bf16.msra.mxu0 %v1798_v2  ;;  %1209 = vmatprep.subr.bf16.mxu1 %v1390_v10  ;;  %v1404_v34 = vld [vmem:[#allocation2 + $0x20] sm:$0xff]   ;;  %v1406_v36 = vld [vmem:[#allocation2 + $0x30] sm:$0xff]   ;;  %v1407_v38 = vld [vmem:[#allocation2 + $0x38] sm:$0xff]  }
  0x77   :  { %1309 = vmatprep.subr.bf16.mxu0 %v1801_v3  ;;  %v1127_v40 = vld [vmem:[%s1875_s4] ss:$0 sm:$0xff]  ;;  %v1409_v6 = vld [vmem:[#allocation10 + $0x40] sm:$0xff]   ;;  %v1411_v10 = vld [vmem:[#allocation10 + $0x48] sm:$0xff]  }
  0x78   :  { %v1408_v8 = vld [vmem:[#allocation5] sm:$0xff]   ;;  %v1410_v9 = vld [vmem:[#allocation10] sm:$0xff]  }
  0x79   :  { %1210 = vmatpush3.bf16.msra.mxu1 %v1391_v12  ;;  %v1412_v12 = vld [vmem:[#allocation10 + $0x8] sm:$0xff]  }
  0x7a   :  { %1310 = vmatpush3.bf16.msra.mxu0 %v1801_v3  ;;  %1211 = vmatprep.subr.bf16.mxu1 %v1392_v13  ;;  %v1413_v13 = vld [vmem:[#allocation10 + $0x50] sm:$0xff]  }
  0x7b   :  { %1311 = vmatprep.subr.bf16.mxu0 %v1804_v5 }
  0x7d   :  { %1212 = vmatpush3.bf16.msra.mxu1 %v1393_v15  ;;  %v1414_v15 = vld [vmem:[#allocation10 + $0x10] sm:$0xff]  }
  0x7e   :  { %1312 = vmatpush3.bf16.msra.mxu0 %v1804_v5  ;;  %1213 = vmatprep.subr.bf16.mxu1 %v1394_v17  ;;  %v1415_v17 = vld [vmem:[#allocation10 + $0x58] sm:$0xff]  }
  0x7f   :  { %1313 = vmatprep.subr.bf16.mxu0 %v1810_v11 }
  0x81   :  { %1214 = vmatpush3.bf16.msra.mxu1 %v1395_v18  ;;  %v1416_v18 = vld [vmem:[#allocation10 + $0x18] sm:$0xff]  }
  0x82   :  { %1314 = vmatpush3.bf16.msra.mxu0 %v1810_v11  ;;  %1215 = vmatprep.subr.bf16.mxu1 %v1396_v19  ;;  %v1417_v19 = vld [vmem:[#allocation10 + $0x60] sm:$0xff]  }
  0x83   :  { %1315 = vmatprep.subr.bf16.mxu0 %v1814_v14 }
  0x85   :  { %1216 = vmatpush3.bf16.msra.mxu1 %v1397_v20  ;;  %v1418_v20 = vld [vmem:[#allocation10 + $0x20] sm:$0xff]  }
  0x86   :  { %1316 = vmatpush3.bf16.msra.mxu0 %v1814_v14  ;;  %1217 = vmatprep.subr.bf16.mxu1 %v1398_v22  ;;  %v1420_v22 = vld [vmem:[#allocation10 + $0x28] sm:$0xff]  }
  0x87   :  { %1317 = vmatprep.subr.bf16.mxu0 %v1816_v16 }
  0x89   :  { %1218 = vmatpush3.bf16.msra.mxu1 %v1399_v23  ;;  %v1421_v23 = vld [vmem:[#allocation10 + $0x70] sm:$0xff]  }
  0x8a   :  { %1318 = vmatpush3.bf16.msra.mxu0 %v1816_v16  ;;  %1219 = vmatprep.subr.bf16.mxu1 %v1400_v24  ;;  %v1422_v24 = vld [vmem:[#allocation10 + $0x30] sm:$0xff]  }
  0x8b   :  { %1335 = vmatprep.subr.bf16.mxu0 %v1625_v37 }
  0x8d   :  { %1320 = vmatmul.mubr.bf16.vlgmr.msra.gmra.mrb[0].mxu0 %v1385_v21  ;;  %1220 = vmatpush3.bf16.msra.mxu1 %v1401_v25  ;;  %v1419_v21 = vld [vmem:[#allocation10 + $0x68] sm:$0xff]  }
  0x8e   :  { %1323 = vmatprep.mubr.bf16.mxu0 %v1402_v32  ;;  %1343 = vmatprep.subr.bf16.mxu1 %v1625_v37 }
  0x95   :  { %1324 = vmatmul.mubr.bf16.gmra.mrb[4].mxu0 %v1403_v33 }
  0x96   :  { %1327 = vmatprep.mubr.bf16.mxu0 %v1404_v34 }
  0x9d   :  { %1328 = vmatmul.mubr.bf16.gmra.mrb[8].mxu0 %v1405_v35 }
  0x9e   :  { %1331 = vmatprep.mubr.bf16.mxu0 %v1406_v36 }
  0xa5   :  { %1332 = vmatmul.mubr.bf16.gmra.mrb[12].mxu0 %v1407_v38 }
  0xa6   :  { %1339 = vmatprep.mubr.msk.bf16.mxu0 %vm1626_vm0, %v1625_v37 }
 0x160   :  { %v1321_v26 = vpop.f32.mrb[0].mxu0 }
 0x161   :  { %v278_v27 = vpop.f32.mrb[1].mxu0 }
 0x162   :  { %v1322_v28 = vpop.f32.mrb[2].mxu0 }
 0x163   :  { %v342_v29 = vpack.c.bf16 %v1322_v28, %v1321_v26  ;;  %v281_v30 = vpop.f32.mrb[3].mxu0 }
 0x164   :  { %v341_v31 = vpack.c.bf16 %v281_v30, %v278_v27 }
 0x166   :  { %516 = vmatprep.mubr.bf16.mxu1 %v341_v31 }
 0x167   :  { %517 = vmatmul.mubr.bf16.vlgmr.msra.gmra.mrb[0].mxu1 %v1791_v0 }
 0x168   :  { %524 = vmatprep.mubr.bf16.mxu1 %v342_v29  ;;  %v1325_v25 = vpop.f32.mrb[4].mxu0 }
 0x169   :  { %v294_v26 = vpop.f32.mrb[5].mxu0 }
 0x16a   :  { %v1326_v27 = vpop.f32.mrb[6].mxu0 }
 0x16b   :  { %v344_v28 = vpack.c.bf16 %v1326_v27, %v1325_v25  ;;  %v297_v29 = vpop.f32.mrb[7].mxu0 }
 0x16c   :  { %v343_v30 = vpack.c.bf16 %v297_v29, %v294_v26 }
 0x16f   :  { %525 = vmatmul.mubr.bf16.gmra.mrb[4].mxu1 %v1793_v1 }
 0x170   :  { %532 = vmatprep.mubr.bf16.mxu1 %v343_v30  ;;  %v1329_v31 = vpop.f32.mrb[8].mxu0 }
 0x171   :  { %v310_v32 = vpop.f32.mrb[9].mxu0 }
 0x172   :  { %v1330_v33 = vpop.f32.mrb[10].mxu0 }
 0x173   :  { %v346_v34 = vpack.c.bf16 %v1330_v33, %v1329_v31  ;;  %v313_v35 = vpop.f32.mrb[11].mxu0 }
 0x174   :  { %v345_v36 = vpack.c.bf16 %v313_v35, %v310_v32 }
 0x177   :  { %533 = vmatmul.mubr.bf16.gmra.mrb[8].mxu1 %v1798_v2 }
 0x178   :  { %540 = vmatprep.mubr.bf16.mxu1 %v344_v28  ;;  %v1333_v38 = vpop.f32.mrb[12].mxu0 }
 0x17f   :  { %541 = vmatmul.mubr.bf16.gmra.mrb[12].mxu1 %v1801_v3  ;;  %v1423_v3 = vld [vmem:[#allocation10 + $0x78] sm:$0xff]  }
 0x180   :  { %548 = vmatprep.mubr.bf16.mxu1 %v345_v36  ;;  %v1180_v36 = vld [vmem:[%s1879_s8] ss:$0 sm:$0xff] }
 0x187   :  { %549 = vmatmul.mubr.bf16.gmra.mrb[16].mxu1 %v1804_v5  ;;  %v1425_v5 = vld [vmem:[#allocation11] sm:$0xff]  }
 0x188   :  { %556 = vmatprep.mubr.bf16.mxu1 %v346_v34  ;;  %1344 = vmatpush3.bf16.msra.mxu1 %v1425_v5 }
 0x189   :  { %1345 = vmatprep.subr.bf16.mxu1 %v1625_v37 }
 0x18f   :  { %557 = vmatmul.mubr.bf16.gmra.mrb[20].mxu1 %v1810_v11 }
 0x23a   :  { %v1221_v39 = vpop.f32.mrb[0].mxu1 }
 0x23b   :  { %v1222_v41 = vpop.f32.mrb[1].mxu1 }
 0x23c   :  { %v1223_v42 = vadd.f32 %v1222_v41, %v1221_v39  ;;  %v1224_v43 = vpop.f32.mrb[2].mxu1  ;;  %v326_v39 = vpop.f32.mrb[13].mxu0 }
 0x23d   :  { %v1225_v44 = vpop.f32.mrb[3].mxu1 }
 0x23e   :  { %v519_v45 = vadd.f32 %v1223_v42, %v1127_v40  ;;  %v1226_v46 = vadd.f32 %v1225_v44, %v1224_v43  ;;  %v1424_v43 = vld [vmem:[#allocation10 + $0x38] sm:$0xff]  }
 0x240   :  { %v1144_v47 = vmul.f32 -1.442695, %v519_v45  ;;  %v522_v48 = vadd.f32 %v1226_v46, %v1127_v40 }
 0x242   :  { %1433 = vpow2.f32 %v1144_v47  ;;  %v1145_v49 = vmul.f32 -1.442695, %v522_v48  ;;  %v1227_v50 = vpop.f32.mrb[4].mxu1 }
 0x243   :  { %v1228_v51 = vpop.f32.mrb[5].mxu1 }
 0x244   :  { %1435 = vpow2.f32 %v1145_v49  ;;  %v1229_v52 = vadd.f32 %v1228_v51, %v1227_v50  ;;  %v1230_v53 = vpop.f32.mrb[6].mxu1 }
 0x245   :  { %v1231_v54 = vpop.f32.mrb[7].mxu1 }
 0x246   :  { %v527_v55 = vadd.f32 %v1229_v52, %v1127_v40  ;;  %v1334_v40 = vpop.f32.mrb[14].mxu0 }
 0x247   :  { %v348_v41 = vpack.c.bf16 %v1334_v40, %v1333_v38  ;;  %v329_v2 = vpop.f32.mrb[15].mxu0 }
 0x248   :  { %v1146_v56 = vmul.f32 -1.442695, %v527_v55  ;;  %v347_v42 = vpack.c.bf16 %v329_v2, %v326_v39 }
 0x24a   :  { %1437 = vpow2.f32 %v1146_v56  ;;  %564 = vmatprep.mubr.bf16.mxu1 %v347_v42 }
 0x24b   :  { %565 = vmatmul.mubr.bf16.gmra.mrb[24].mxu1 %v1814_v14  ;;  %v1233_v14 = vpop.f32.mrb[8].mxu1 }
 0x24c   :  { %v1434_v57 = vpop.eup %1433  ;;  %572 = vmatprep.mubr.bf16.mxu1 %v348_v41  ;;  %v1234_v48 = vpop.f32.mrb[9].mxu1 }
 0x24d   :  { %v629_v58 = vadd.f32 1.0, %v1434_v57  ;;  %v1236_v49 = vpop.f32.mrb[10].mxu1 }
 0x24e   :  { %v1436_v59 = vpop.eup %1435 }
 0x24f   :  { %v630_v60 = vadd.f32 1.0, %v1436_v59  ;;  %1439 = vrcp.f32 %v629_v58 }
 0x251   :  { %1441 = vrcp.f32 %v630_v60 }
 0x253   :  { %573 = vmatmul.mubr.bf16.gmra.mrb[28].mxu1 %v1816_v16  ;;  %v1237_v16 = vpop.f32.mrb[11].mxu1 }
 0x254   :  { %v1438_v61 = vpop.eup %1437  ;;  %1359 = vmatprep.mubr.msk.bf16.mxu1 %vm1626_vm0, %v1625_v37  ;;  %v1239_v50 = vpop.f32.mrb[12].mxu1 }
 0x255   :  { %v631_v62 = vadd.f32 1.0, %v1438_v61  ;;  %v1240_v51 = vpop.f32.mrb[13].mxu1 }
 0x256   :  { %v1242_v52 = vpop.f32.mrb[14].mxu1 }
 0x257   :  { %1443 = vrcp.f32 %v631_v62  ;;  %v1243_v53 = vpop.f32.mrb[15].mxu1 }
 0x259   :  { %v1440_v63 = vpop.eup %1439 }
 0x25a   :  { %v1245_v54 = vpop.f32.mrb[16].mxu1 }
 0x25b   :  { %v1442_v0 = vpop.eup %1441  ;;  %v1246_v55 = vpop.f32.mrb[17].mxu1 }
 0x25c   :  { %v1832_v1 = vpack.c.bf16 %v1442_v0, %v1440_v63  ;;  %v1248_v56 = vpop.f32.mrb[18].mxu1 }
 0x25d   :  { %v1249_v57 = vpop.f32.mrb[19].mxu1 }
 0x25e   :  { %1336 = vmatpush3.bf16.msra.mxu0 %v1832_v1 }
 0x25f   :  { %1337 = vmatprep.subr.bf16.mxu0 %v1625_v37 }
 0x261   :  { %v1444_v4 = vpop.eup %1443 }
 0x262   :  { %v727_v7 = vpack.c.bf16 %v1625_v37, %v1444_v4  ;;  %v1251_v58 = vpop.f32.mrb[20].mxu1 }
 0x263   :  { %v1252_v59 = vpop.f32.mrb[21].mxu1 }
 0x264   :  { %1338 = vmatpush3.bf16.msra.mxu0 %v727_v7  ;;  %v1254_v60 = vpop.f32.mrb[22].mxu1 }
 0x265   :  { %1272 = vmatprep.subr.bf16.mxu0 %v1409_v6  ;;  %v1255_v61 = vpop.f32.mrb[23].mxu1 }
 0x267   :  { %1340 = vmatmul.mubr.bf16.vlgmr.msra.gmra.mrb[16].mxu0 %v1408_v8 }
 0x268   :  { %1273 = vmatpush3.bf16.msra.mxu0 %v1410_v9  ;;  %v1426_v9 = vld [vmem:[#allocation11 + $0x8] sm:$0xff]  }
 0x269   :  { %1274 = vmatprep.subr.bf16.mxu0 %v1411_v10  ;;  %1346 = vmatpush3.bf16.msra.mxu1 %v1426_v9  ;;  %v1427_v10 = vld [vmem:[#allocation11 + $0x10] sm:$0xff]  }
 0x26a   :  { %1347 = vmatprep.subr.bf16.mxu1 %v1625_v37 }
 0x26c   :  { %1275 = vmatpush3.bf16.msra.mxu0 %v1412_v12  ;;  %v1428_v12 = vld [vmem:[#allocation11 + $0x18] sm:$0xff]  }
 0x26d   :  { %1276 = vmatprep.subr.bf16.mxu0 %v1413_v13  ;;  %1348 = vmatpush3.bf16.msra.mxu1 %v1427_v10  ;;  %v1429_v13 = vld [vmem:[#allocation11 + $0x20] sm:$0xff]  }
 0x26e   :  { %1349 = vmatprep.subr.bf16.mxu1 %v1625_v37 }
 0x270   :  { %1277 = vmatpush3.bf16.msra.mxu0 %v1414_v15  ;;  %v1430_v15 = vld [vmem:[#allocation11 + $0x28] sm:$0xff]  }
 0x271   :  { %1278 = vmatprep.subr.bf16.mxu0 %v1415_v17  ;;  %1350 = vmatpush3.bf16.msra.mxu1 %v1428_v12  ;;  %v1431_v17 = vld [vmem:[#allocation11 + $0x30] sm:$0xff]  }
 0x272   :  { %1351 = vmatprep.subr.bf16.mxu1 %v1625_v37 }
 0x274   :  { %1279 = vmatpush3.bf16.msra.mxu0 %v1416_v18  ;;  %v1432_v18 = vld [vmem:[#allocation11 + $0x38] sm:$0xff]  }
 0x275   :  { %1280 = vmatprep.subr.bf16.mxu0 %v1417_v19  ;;  %1352 = vmatpush3.bf16.msra.mxu1 %v1429_v13 }
 0x276   :  { %1353 = vmatprep.subr.bf16.mxu1 %v1625_v37 }
 0x278   :  { %1281 = vmatpush3.bf16.msra.mxu0 %v1418_v20  ;;  %v1161_v20 = vld [vmem:[%s1877_s6] ss:$0 sm:$0xff] }
 0x279   :  { %1282 = vmatprep.subr.bf16.mxu0 %v1419_v21  ;;  %1354 = vmatpush3.bf16.msra.mxu1 %v1430_v15 }
 0x27a   :  { %1355 = vmatprep.subr.bf16.mxu1 %v1625_v37 }
 0x27c   :  { %1283 = vmatpush3.bf16.msra.mxu0 %v1420_v22 }
 0x27d   :  { %1284 = vmatprep.subr.bf16.mxu0 %v1421_v23  ;;  %1356 = vmatpush3.bf16.msra.mxu1 %v1431_v17 }
 0x27e   :  { %1357 = vmatprep.subr.bf16.mxu1 %v1625_v37 }
 0x280   :  { %1285 = vmatpush3.bf16.msra.mxu0 %v1422_v24 }
 0x281   :  { %1286 = vmatprep.subr.bf16.mxu0 %v1423_v3  ;;  %1358 = vmatpush3.bf16.msra.mxu1 %v1432_v18 }
 0x284   :  { %1287 = vmatpush3.bf16.msra.mxu0 %v1424_v43 }
 0x31e   :  { %v1257_v62 = vpop.f32.mrb[24].mxu1 }
 0x31f   :  { %v1258_v63 = vpop.f32.mrb[25].mxu1 }
 0x320   :  { %v1260_v0 = vpop.f32.mrb[26].mxu1 }
 0x33a   :  { %v776_v11 = vpop.f32.mrb[16].mxu0 }
 0x33b   :  { %v1341_v44 = vpop.f32.mrb[17].mxu0 }
 0x33c   :  { %v779_v45 = vpop.f32.mrb[18].mxu0 }
 0x33d   :  { %v783_v46 = vpack.c.bf16 %v779_v45, %v776_v11  ;;  %v1342_v47 = vpop.f32.mrb[19].mxu0 }
 0x33f   :  { %951 = vmatprep.mubr.bf16.mxu0 %v783_v46 }
 0x340   :  { %952 = vmatmul.mubr.bf16.vlgmr.msra.gmra.mrb[20].mxu0 %v1832_v1  ;;  %v1261_v1 = vpop.f32.mrb[27].mxu1 }
 0x341   :  { %v1263_v4 = vpop.f32.mrb[28].mxu1 }
 0x342   :  { %v1264_v6 = vpop.f32.mrb[29].mxu1 }
 0x343   :  { %v1266_v7 = vpop.f32.mrb[30].mxu1 }
 0x344   :  { %v1267_v8 = vpop.f32.mrb[31].mxu1 }
 0x413   :  { %v1288_v19 = vpop.f32.mrb[20].mxu0 }
 0x414   :  { %v1289_v21 = vpop.f32.mrb[21].mxu0 }
 0x415   :  { %v1290_v22 = vadd.f32 %v1289_v21, %v1288_v19  ;;  %v1291_v23 = vpop.f32.mrb[22].mxu0 }
 0x416   :  { %v1292_v24 = vpop.f32.mrb[23].mxu0 }
 0x417   :  { %v954_v25 = vadd.f32 %v1290_v22, %v1161_v20  ;;  %v1293_v26 = vadd.f32 %v1292_v24, %v1291_v23 }
 0x419   :  { %v1178_v27 = vmul.f32 -1.442695, %v954_v25  ;;  %v957_v28 = vadd.f32 %v1293_v26, %v1161_v20 }
 0x41b   :  { %1445 = vpow2.f32 %v1178_v27  ;;  %v1179_v29 = vmul.f32 -1.442695, %v957_v28 }
 0x41d   :  { %1447 = vpow2.f32 %v1179_v29 }
 0x425   :  { %v1446_v30 = vpop.eup %1445 }
 0x426   :  { %v966_v31 = vadd.f32 1.0, %v1446_v30 }
 0x427   :  { %v1448_v37 = vpop.eup %1447 }
 0x428   :  { %v967_v32 = vadd.f32 1.0, %v1448_v37  ;;  %1449 = vrcp.f32 %v966_v31 }
 0x42a   :  { %1451 = vrcp.f32 %v967_v32 }
 0x432   :  { %v1450_v33 = vpop.eup %1449 }
 0x434   :  { %v1452_v34 = vpop.eup %1451 }
 0x435   :  { %v976_v35 = vpack.c.bf16 %v1452_v34, %v1450_v33 }
 0x437   :  { %1360 = vmatmul.mubr.bf16.vlgmr.msra.gmra.mrb[32].mxu1 %v976_v35 }
 0x50a   :  { %v1082_v38 = vpop.f32.mrb[32].mxu1 }
 0x50b   :  { %v1083_v39 = vadd.f32 %v1180_v36, %v1082_v38  ;;  %v1361_v40 = vpop.f32.mrb[33].mxu1 }
 0x50c   :  { %v1085_v41 = vpop.f32.mrb[34].mxu1 }
 0x50d   :  { %1089 = vst [vmem:[#allocation13] sm:$0xff] %v1083_v39  ;;  %v1086_v2 = vadd.f32 %v1180_v36, %v1085_v41  ;;  %v1362_v42 = vpop.f32.mrb[35].mxu1 }
 0x50f   :  { %1090 = vst [vmem:[#allocation13 + $0x8] sm:$0xff] %v1086_v2 }
 0x510   :  { %1596 = shalt.err (!%p1593_p10)
}
 0x511   :  { %s1597_s24 = scalar_lea.hbm %s1880_s9, 256 }
 0x512   :  { %p1598_p11 = scmp.ne.s32.totalorder %s1880_s9, %s1597_s24  ;;  %p1601_p12 = scmp.lt.u32.totalorder %s1597_s24, %s1880_s9 }
 0x514   :  { %p1603_p13 = pnand %p1601_p12, %p1598_p11 }
 0x516   :  { %1606 = shalt.err (!%p1603_p13)
}
 0x517   :  { %s1628_s27 = smov 128   ;;  %s1629_s2 = smov 8  }
 0x518   :  { %1102 = dma.vmem_to_hbm [thread:$0]  %s1097_s19, 256, %s1880_s9, [#allocation4], %s1628_s27, %s1628_s27, %s1629_s2  }
 0x519   :  { %1615 = dma.done.wait [#allocation4], 256  }
 0x51a   :  { %1616 = vsyncadd [#allocation4], 4294967040 }
 0x51b   :  { %1106 = vsyncpa [#allocation3], 1 }
 0x51c   :  { %1107 = vsyncpa [#allocation6], 1 }
 0x51d   :  { %1108 = vsyncpa [#allocation9], 1 }
 0x51e   :  { %1109 = vsyncpa [#allocation12], 1 }
 0x51f   :  { %1110 = vsyncpa [#allocation4], 1 }

</bundles_post_ra>
